<compile_context>
chip_gen: v7x
topology: tpu7x:2x2x1
jax: 0.10.0
libtpu: 0.0.40
codegen_flags: <defaults>
</compile_context>

<pallas_src>
import jax
import jax.numpy as jnp
from jax.experimental import pallas as pl
from jax.experimental.pallas import tpu as pltpu


K_IN = 784
HID = 64
N_OUT = 10
N_PAD = 128          # lane-dense output slab
NEG_BIG = -1e30      # f32 bias for padded classes -> exp() == 0


def mlp_kernel(x_ref, w1_ref, b1_ref, w2_ref, b2_ref, w3_ref, b3_ref,
               w4_ref, b4_ref, o_ref):
    # x tile: (TB, 784) f32 -> cast to bf16 for the MXU; accumulate, bias add,
    # ReLU and softmax stay in f32 (v5e-safe elementwise path).
    x = x_ref[...].astype(jnp.bfloat16)

    # linear1 + ReLU
    h = jnp.dot(x, w1_ref[...], preferred_element_type=jnp.float32) + b1_ref[...]
    h = jnp.maximum(h, 0.0)
    # linear2 + ReLU
    h = jnp.dot(h.astype(jnp.bfloat16), w2_ref[...],
                preferred_element_type=jnp.float32) + b2_ref[...]
    h = jnp.maximum(h, 0.0)
    # linear3 + ReLU
    h = jnp.dot(h.astype(jnp.bfloat16), w3_ref[...],
                preferred_element_type=jnp.float32) + b3_ref[...]
    h = jnp.maximum(h, 0.0)
    # linear4 (padded classes get bias -1e30 -> zero softmax weight)
    logits = jnp.dot(h.astype(jnp.bfloat16), w4_ref[...],
                     preferred_element_type=jnp.float32) + b4_ref[...]

    # softmax over the (padded) class axis, all in f32, exact normalization
    m = jnp.max(logits, axis=-1, keepdims=True)
    e = jnp.exp(logits - m)
    denom = jnp.sum(e, axis=-1, keepdims=True)
    o_ref[...] = e / denom


def _choose_tb(b):
    # Single block up to 1024 rows (a block dim equal to the full array dim is
    # always legal); beyond that use 1024-row tiles and let the grid + partial
    # final block handle the tail.
    return b if b <= 1024 else 1024


def mlp_forward(x, params):
    """x: (B, 784) f32; params: 4 x (W (in,out) f32, b (1,out) f32)."""
    (w1, b1), (w2, b2), (w3, b3), (w4, b4) = params
    B = x.shape[0]

    tb = _choose_tb(B)
    grid = (pl.cdiv(B, tb),)

    # --- weights: cast to bf16 (tiny, one-time); pad only the class dim -----
    w1b = w1.astype(jnp.bfloat16)
    w2b = w2.astype(jnp.bfloat16)
    w3b = w3.astype(jnp.bfloat16)
    w4p = jnp.zeros((HID, N_PAD), jnp.float32).at[:, :N_OUT].set(w4)
    w4b = w4p.astype(jnp.bfloat16)
    b4p = jnp.full((1, N_PAD), NEG_BIG, jnp.float32).at[:, :N_OUT].set(b4)

    # --- specs ---------------------------------------------------------------
    x_spec = pl.BlockSpec((tb, K_IN), lambda i: (i, 0))
    out_spec = pl.BlockSpec((tb, N_PAD), lambda i: (i, 0))
    # constant index_map -> weights/biases DMA'd once, stay VMEM-resident
    const = lambda shape: pl.BlockSpec(shape, lambda i: (0, 0))

    flops_per_row = 2 * (K_IN * HID + HID * HID + HID * HID + HID * N_PAD)
    bytes_accessed = (
        B * K_IN * 4
        + (w1b.size + w2b.size + w3b.size + w4b.size) * 2
        + (b1.size + b2.size + b3.size + b4p.size) * 4
        + B * N_PAD * 4
    )
    cost = pl.CostEstimate(
        flops=B * flops_per_row,
        transcendentals=B * N_PAD,
        bytes_accessed=bytes_accessed,
    )

    out = pl.pallas_call(
        mlp_kernel,
        out_shape=jax.ShapeDtypeStruct((B, N_PAD), jnp.float32),
        grid_spec=pltpu.PrefetchScalarGridSpec(
            num_scalar_prefetch=0,
            grid=grid,
            in_specs=[
                x_spec,
                const(w1b.shape), const(b1.shape),
                const(w2b.shape), const(b2.shape),
                const(w3b.shape), const(b3.shape),
                const(w4b.shape), const(b4p.shape),
            ],
            out_specs=out_spec,
        ),
        compiler_params=pltpu.CompilerParams(
            dimension_semantics=("parallel",),
            vmem_limit_bytes=32 * 1024 * 1024,
        ),
        cost_estimate=cost,
    )(x, w1b, b1, w2b, b2, w3b, b3, w4b, b4p)

    # TODO(synk): on v7x, consider CORE_PARALLEL / pl.core_map to split the
    # batch grid across the two TensorCores explicitly.
    return out[:B, :N_OUT]


def init_linear(key, fan_in, fan_out):
    # PyTorch nn.Linear default init: U(-1/sqrt(fan_in), 1/sqrt(fan_in))
    kw, kb = jax.random.split(key)
    bound = 1.0 / jnp.sqrt(fan_in)
    w = jax.random.uniform(kw, (fan_in, fan_out), jnp.float32, -bound, bound)
    b = jax.random.uniform(kb, (1, fan_out), jnp.float32, -bound, bound)
    return w, b


def reference_forward(x, params):
    # Mirrors the kernel's bf16-MXU / f32-accumulate numerics.
    h = x.astype(jnp.bfloat16)
    for i, (w, b) in enumerate(params):
        h = jnp.dot(h, w.astype(jnp.bfloat16),
                    preferred_element_type=jnp.float32) + b
        if i < 3:
            h = jnp.maximum(h, 0.0).astype(jnp.bfloat16)
    return jax.nn.softmax(h, axis=-1)


if __name__ == "__main__":
    key = jax.random.PRNGKey(0)
    k_x, k1, k2, k3, k4 = jax.random.split(key, 5)

    B = 8
    x = jax.random.normal(k_x, (B, K_IN), jnp.float32)

    params = (
        init_linear(k1, K_IN, HID),
        init_linear(k2, HID, HID),
        init_linear(k3, HID, HID),
        init_linear(k4, HID, N_OUT),
    )

    out = mlp_forward(x, params)
    out = jax.block_until_ready(out)

    ref = reference_forward(x, params)
    assert out.shape == (B, N_OUT)
    assert jnp.allclose(out, ref, atol=2e-3, rtol=0), float(jnp.max(jnp.abs(out - ref)))
    assert jnp.allclose(jnp.sum(out, axis=-1), 1.0, atol=1e-3)

    print("KERNEL_OK")
</pallas_src>

<mosaic_0001>
module attributes {stable_mosaic.version = 11 : i64} {
  func.func @mlp_kernel(%arg0: i32, %arg1: memref<8x784xf32, #tpu.memory_space<vmem>>, %arg2: memref<784x64xbf16, #tpu.memory_space<vmem>>, %arg3: memref<1x64xf32, #tpu.memory_space<vmem>>, %arg4: memref<64x64xbf16, #tpu.memory_space<vmem>>, %arg5: memref<1x64xf32, #tpu.memory_space<vmem>>, %arg6: memref<64x64xbf16, #tpu.memory_space<vmem>>, %arg7: memref<1x64xf32, #tpu.memory_space<vmem>>, %arg8: memref<64x128xbf16, #tpu.memory_space<vmem>>, %arg9: memref<1x128xf32, #tpu.memory_space<vmem>>, %arg10: memref<8x128xf32, #tpu.memory_space<vmem>>) attributes {dimension_semantics = [#tpu.dimension_semantics<parallel>], iteration_bounds = array<i64: 1>, scalar_prefetch = 0 : i64, scratch_operands = 0 : i64, tpu.core_type = #tpu.core_type<tc>, window_params = [{transform_indices = @transform_0, window_bounds = array<i64: 8, 784>}, {pipeline_mode = #tpu.pipeline_mode<synchronous>, transform_indices = @transform_1, window_bounds = array<i64: 784, 64>}, {pipeline_mode = #tpu.pipeline_mode<synchronous>, transform_indices = @transform_2, window_bounds = array<i64: 1, 64>}, {pipeline_mode = #tpu.pipeline_mode<synchronous>, transform_indices = @transform_3, window_bounds = array<i64: 64, 64>}, {pipeline_mode = #tpu.pipeline_mode<synchronous>, transform_indices = @transform_4, window_bounds = array<i64: 1, 64>}, {pipeline_mode = #tpu.pipeline_mode<synchronous>, transform_indices = @transform_5, window_bounds = array<i64: 64, 64>}, {pipeline_mode = #tpu.pipeline_mode<synchronous>, transform_indices = @transform_6, window_bounds = array<i64: 1, 64>}, {pipeline_mode = #tpu.pipeline_mode<synchronous>, transform_indices = @transform_7, window_bounds = array<i64: 64, 128>}, {pipeline_mode = #tpu.pipeline_mode<synchronous>, transform_indices = @transform_8, window_bounds = array<i64: 1, 128>}, {transform_indices = @transform_9, window_bounds = array<i64: 8, 128>}]} {
    %c0 = arith.constant 0 : index
    %c0_0 = arith.constant 0 : index
    %0 = vector.load %arg1[%c0, %c0_0] : memref<8x784xf32, #tpu.memory_space<vmem>>, vector<8x784xf32>
    %1 = arith.truncf %0 : vector<8x784xf32> to vector<8x784xbf16>
    %c0_1 = arith.constant 0 : index
    %c0_2 = arith.constant 0 : index
    %2 = vector.load %arg2[%c0_1, %c0_2] : memref<784x64xbf16, #tpu.memory_space<vmem>>, vector<784x64xbf16>
    %cst = arith.constant dense<0.000000e+00> : vector<8x64xf32>
    %3 = tpu.matmul %1, %2, %cst {dimension_numbers = #tpu.dot_dimension_numbers<[1], [0], [0], [1], [0, 0, 1, 1], [], []>} : vector<8x784xbf16>, vector<784x64xbf16>, vector<8x64xf32> -> vector<8x64xf32>
    %c0_3 = arith.constant 0 : index
    %c0_4 = arith.constant 0 : index
    %4 = vector.load %arg3[%c0_3, %c0_4] : memref<1x64xf32, #tpu.memory_space<vmem>>, vector<1x64xf32>
    %5 = vector.broadcast %4 : vector<1x64xf32> to vector<8x64xf32>
    %6 = arith.addf %3, %5 : vector<8x64xf32>
    %cst_5 = arith.constant 0.000000e+00 : f32
    %7 = vector.broadcast %cst_5 : f32 to vector<8x64xf32>
    %8 = arith.maximumf %6, %7 : vector<8x64xf32>
    %9 = arith.truncf %8 : vector<8x64xf32> to vector<8x64xbf16>
    %c0_6 = arith.constant 0 : index
    %c0_7 = arith.constant 0 : index
    %10 = vector.load %arg4[%c0_6, %c0_7] : memref<64x64xbf16, #tpu.memory_space<vmem>>, vector<64x64xbf16>
    %cst_8 = arith.constant dense<0.000000e+00> : vector<8x64xf32>
    %11 = tpu.matmul %9, %10, %cst_8 {dimension_numbers = #tpu.dot_dimension_numbers<[1], [0], [0], [1], [0, 0, 1, 1], [], []>} : vector<8x64xbf16>, vector<64x64xbf16>, vector<8x64xf32> -> vector<8x64xf32>
    %c0_9 = arith.constant 0 : index
    %c0_10 = arith.constant 0 : index
    %12 = vector.load %arg5[%c0_9, %c0_10] : memref<1x64xf32, #tpu.memory_space<vmem>>, vector<1x64xf32>
    %13 = vector.broadcast %12 : vector<1x64xf32> to vector<8x64xf32>
    %14 = arith.addf %11, %13 : vector<8x64xf32>
    %cst_11 = arith.constant 0.000000e+00 : f32
    %15 = vector.broadcast %cst_11 : f32 to vector<8x64xf32>
    %16 = arith.maximumf %14, %15 : vector<8x64xf32>
    %17 = arith.truncf %16 : vector<8x64xf32> to vector<8x64xbf16>
    %c0_12 = arith.constant 0 : index
    %c0_13 = arith.constant 0 : index
    %18 = vector.load %arg6[%c0_12, %c0_13] : memref<64x64xbf16, #tpu.memory_space<vmem>>, vector<64x64xbf16>
    %cst_14 = arith.constant dense<0.000000e+00> : vector<8x64xf32>
    %19 = tpu.matmul %17, %18, %cst_14 {dimension_numbers = #tpu.dot_dimension_numbers<[1], [0], [0], [1], [0, 0, 1, 1], [], []>} : vector<8x64xbf16>, vector<64x64xbf16>, vector<8x64xf32> -> vector<8x64xf32>
    %c0_15 = arith.constant 0 : index
    %c0_16 = arith.constant 0 : index
    %20 = vector.load %arg7[%c0_15, %c0_16] : memref<1x64xf32, #tpu.memory_space<vmem>>, vector<1x64xf32>
    %21 = vector.broadcast %20 : vector<1x64xf32> to vector<8x64xf32>
    %22 = arith.addf %19, %21 : vector<8x64xf32>
    %cst_17 = arith.constant 0.000000e+00 : f32
    %23 = vector.broadcast %cst_17 : f32 to vector<8x64xf32>
    %24 = arith.maximumf %22, %23 : vector<8x64xf32>
    %25 = arith.truncf %24 : vector<8x64xf32> to vector<8x64xbf16>
    %c0_18 = arith.constant 0 : index
    %c0_19 = arith.constant 0 : index
    %26 = vector.load %arg8[%c0_18, %c0_19] : memref<64x128xbf16, #tpu.memory_space<vmem>>, vector<64x128xbf16>
    %cst_20 = arith.constant dense<0.000000e+00> : vector<8x128xf32>
    %27 = tpu.matmul %25, %26, %cst_20 {dimension_numbers = #tpu.dot_dimension_numbers<[1], [0], [0], [1], [0, 0, 1, 1], [], []>} : vector<8x64xbf16>, vector<64x128xbf16>, vector<8x128xf32> -> vector<8x128xf32>
    %c0_21 = arith.constant 0 : index
    %c0_22 = arith.constant 0 : index
    %28 = vector.load %arg9[%c0_21, %c0_22] : memref<1x128xf32, #tpu.memory_space<vmem>>, vector<1x128xf32>
    %29 = vector.broadcast %28 : vector<1x128xf32> to vector<8x128xf32>
    %30 = arith.addf %27, %29 : vector<8x128xf32>
    %cst_23 = arith.constant dense<0xFF800000> : vector<8xf32>
    %31 = vector.multi_reduction <maximumf>, %30, %cst_23 [1] : vector<8x128xf32> to vector<8xf32>
    %32 = vector.shape_cast %31 : vector<8xf32> to vector<8x1xf32>
    %33 = vector.broadcast %32 : vector<8x1xf32> to vector<8x128xf32>
    %34 = arith.subf %30, %33 : vector<8x128xf32>
    %35 = math.exp %34 : vector<8x128xf32>
    %cst_24 = arith.constant dense<0.000000e+00> : vector<8xf32>
    %36 = vector.multi_reduction <add>, %35, %cst_24 [1] : vector<8x128xf32> to vector<8xf32>
    %37 = vector.shape_cast %36 : vector<8xf32> to vector<8x1xf32>
    %38 = vector.broadcast %37 : vector<8x1xf32> to vector<8x128xf32>
    %39 = arith.divf %35, %38 : vector<8x128xf32>
    %c0_25 = arith.constant 0 : index
    %c0_26 = arith.constant 0 : index
    %40 = vector.load %arg10[%c0_25, %c0_26] : memref<8x128xf32, #tpu.memory_space<vmem>>, vector<8x128xf32>
    tpu.vector_store %arg10[%c0_25, %c0_26], %39 {strides = array<i32>} : memref<8x128xf32, #tpu.memory_space<vmem>>, vector<8x128xf32>,
    return
  }
  func.func @transform_0(%arg0: i32) -> (i32, i32) {
    %c0_i32 = arith.constant 0 : i32
    %c0_i32_0 = arith.constant 0 : i32
    return %arg0, %c0_i32 : i32, i32
  }
  func.func @transform_1(%arg0: i32) -> (i32, i32) {
    %c0_i32 = arith.constant 0 : i32
    %c0_i32_0 = arith.constant 0 : i32
    %c0_i32_1 = arith.constant 0 : i32
    return %c0_i32, %c0_i32_0 : i32, i32
  }
  func.func @transform_2(%arg0: i32) -> (i32, i32) {
    %c0_i32 = arith.constant 0 : i32
    %c0_i32_0 = arith.constant 0 : i32
    %c0_i32_1 = arith.constant 0 : i32
    return %c0_i32, %c0_i32_0 : i32, i32
  }
  func.func @transform_3(%arg0: i32) -> (i32, i32) {
    %c0_i32 = arith.constant 0 : i32
    %c0_i32_0 = arith.constant 0 : i32
    %c0_i32_1 = arith.constant 0 : i32
    return %c0_i32, %c0_i32_0 : i32, i32
  }
  func.func @transform_4(%arg0: i32) -> (i32, i32) {
    %c0_i32 = arith.constant 0 : i32
    %c0_i32_0 = arith.constant 0 : i32
    %c0_i32_1 = arith.constant 0 : i32
    return %c0_i32, %c0_i32_0 : i32, i32
  }
  func.func @transform_5(%arg0: i32) -> (i32, i32) {
    %c0_i32 = arith.constant 0 : i32
    %c0_i32_0 = arith.constant 0 : i32
    %c0_i32_1 = arith.constant 0 : i32
    return %c0_i32, %c0_i32_0 : i32, i32
  }
  func.func @transform_6(%arg0: i32) -> (i32, i32) {
    %c0_i32 = arith.constant 0 : i32
    %c0_i32_0 = arith.constant 0 : i32
    %c0_i32_1 = arith.constant 0 : i32
    return %c0_i32, %c0_i32_0 : i32, i32
  }
  func.func @transform_7(%arg0: i32) -> (i32, i32) {
    %c0_i32 = arith.constant 0 : i32
    %c0_i32_0 = arith.constant 0 : i32
    %c0_i32_1 = arith.constant 0 : i32
    return %c0_i32, %c0_i32_0 : i32, i32
  }
  func.func @transform_8(%arg0: i32) -> (i32, i32) {
    %c0_i32 = arith.constant 0 : i32
    %c0_i32_0 = arith.constant 0 : i32
    %c0_i32_1 = arith.constant 0 : i32
    return %c0_i32, %c0_i32_0 : i32, i32
  }
  func.func @transform_9(%arg0: i32) -> (i32, i32) {
    %c0_i32 = arith.constant 0 : i32
    %c0_i32_0 = arith.constant 0 : i32
    return %arg0, %c0_i32 : i32, i32
  }
}

</mosaic_0001>

<bundles_post_ra>
// kernel: tpu_custom_call.1
= control target key start
LH: loop header
LB: loop body
LE: loop exit
PB: predicated region body
PF: predicated region fallthrough
CT: control target
= control target key end

     0   :  { %v1174_v44 = vmov 0.0   ;;  %vm1175_vm0 = vmmov 0   ;;  %vm447_vm1 = vcmask 130048   ;;  %s1479_s0 = inlined_call_operand.vmem [shape: f32[8,784], index: 0, kind: input, shape index: {}]   ;;  %s1480_s1 = inlined_call_operand.vmem [shape: bf16[784,64], index: 1, kind: input, shape index: {}]   ;;  %s1481_s2 = inlined_call_operand.vmem [shape: f32[1,64], index: 2, kind: input, shape index: {}]   ;;  %s1482_s3 = inlined_call_operand.vmem [shape: bf16[64,64], index: 3, kind: input, shape index: {}]   ;;  %s1483_s4 = inlined_call_operand.vmem [shape: f32[1,64], index: 4, kind: input, shape index: {}]   ;;  %s1484_s5 = inlined_call_operand.vmem [shape: bf16[64,64], index: 5, kind: input, shape index: {}]   ;;  %s1485_s6 = inlined_call_operand.vmem [shape: f32[1,64], index: 6, kind: input, shape index: {}]   ;;  %s1486_s7 = inlined_call_operand.vmem [shape: bf16[64,128], index: 7, kind: input, shape index: {}]   ;;  %s1487_s8 = inlined_call_operand.vmem [shape: f32[1,128], index: 8, kind: input, shape index: {}]   ;;  %s1488_s9 = inlined_call_operand.hbm [shape: f32[8,128], index: 9, kind: output, shape index: {}]  }
   0x1   :  { %v1085_v0 = vld [vmem:[%s1480_s1 + $0x40] sm:$0xff]   ;;  %v1089_v4 = vld [vmem:[%s1480_s1 + $0x48] sm:$0xff]   ;;  %v1093_v8 = vld [vmem:[%s1480_s1 + $0x50] sm:$0xff]  }
   0x2   :  { %v1086_v1 = vld [vmem:[%s1480_s1] sm:$0xff]   ;;  %957 = vmatprep.subr.bf16.mxu0 %v1085_v0  ;;  %v1090_v5 = vld [vmem:[%s1480_s1 + $0x8] sm:$0xff]   ;;  %v1094_v9 = vld [vmem:[%s1480_s1 + $0x10] sm:$0xff]  }
   0x3   :  { %v1087_v2 = vld [vmem:[%s1480_s1 + $0xc0] sm:$0xff]   ;;  %958 = vmatpush3.bf16.msra.mxu0 %v1086_v1  ;;  %v1091_v6 = vld [vmem:[%s1480_s1 + $0xc8] sm:$0xff]   ;;  %v1095_v10 = vld [vmem:[%s1480_s1 + $0xd0] sm:$0xff]  }
   0x4   :  { %v1088_v3 = vld [vmem:[%s1480_s1 + $0x80] sm:$0xff]   ;;  %979 = vmatprep.subr.bf16.mxu1 %v1087_v2  ;;  %959 = vmatprep.subr.bf16.mxu0 %v1089_v4  ;;  %v1092_v7 = vld [vmem:[%s1480_s1 + $0x88] sm:$0xff]   ;;  %v1096_v11 = vld [vmem:[%s1480_s1 + $0x90] sm:$0xff]  }
   0x5   :  { %980 = vmatpush3.bf16.msra.mxu1 %v1088_v3  ;;  %v1097_v12 = vld [vmem:[%s1480_s1 + $0x58] sm:$0xff]   ;;  %v1101_v16 = vld [vmem:[%s1480_s1 + $0x60] sm:$0xff]   ;;  %v1105_v20 = vld [vmem:[%s1480_s1 + $0x68] sm:$0xff]  }
   0x6   :  { %981 = vmatprep.subr.bf16.mxu1 %v1091_v6  ;;  %v1098_v13 = vld [vmem:[%s1480_s1 + $0x18] sm:$0xff]   ;;  %v1102_v17 = vld [vmem:[%s1480_s1 + $0x20] sm:$0xff]   ;;  %v1106_v21 = vld [vmem:[%s1480_s1 + $0x28] sm:$0xff]  }
   0x7   :  { %960 = vmatpush3.bf16.msra.mxu0 %v1090_v5  ;;  %v1099_v14 = vld [vmem:[%s1480_s1 + $0xd8] sm:$0xff]   ;;  %v1103_v18 = vld [vmem:[%s1480_s1 + $0xe0] sm:$0xff]   ;;  %v1107_v22 = vld [vmem:[%s1480_s1 + $0xe8] sm:$0xff]  }
   0x8   :  { %961 = vmatprep.subr.bf16.mxu0 %v1093_v8  ;;  %v1100_v15 = vld [vmem:[%s1480_s1 + $0x98] sm:$0xff]   ;;  %v1104_v19 = vld [vmem:[%s1480_s1 + $0xa0] sm:$0xff]   ;;  %v1108_v23 = vld [vmem:[%s1480_s1 + $0xa8] sm:$0xff]  }
   0x9   :  { %982 = vmatpush3.bf16.msra.mxu1 %v1092_v7  ;;  %v1109_v24 = vld [vmem:[%s1480_s1 + $0x70] sm:$0xff]   ;;  %v1113_v28 = vld [vmem:[%s1480_s1 + $0x78] sm:$0xff]   ;;  %v35_v31 = vld [vmem:[%s1479_s0 + $0x8] sm:$0xff] }
   0xa   :  { %983 = vmatprep.subr.bf16.mxu1 %v1095_v10  ;;  %v1110_v25 = vld [vmem:[%s1480_s1 + $0x30] sm:$0xff]   ;;  %v1114_v29 = vld [vmem:[%s1480_s1 + $0x38] sm:$0xff]   ;;  %v42_v32 = vpack.c.bf16 %v35_v31, %v35_v31  ;;  %v34_v34 = vld [vmem:[%s1479_s0] sm:$0xff] }
   0xb   :  { %962 = vmatpush3.bf16.msra.mxu0 %v1094_v9  ;;  %v1111_v26 = vld [vmem:[%s1480_s1 + $0xf0] sm:$0xff]   ;;  %v1115_v30 = vld [vmem:[%s1480_s1 + $0xf8] sm:$0xff]   ;;  %v41_v35 = vpack.c.bf16 %v34_v34, %v34_v34  ;;  %v1117_v36 = vld [vmem:[%s1480_s1 + $0x140] sm:$0xff]  }
   0xc   :  { %963 = vmatprep.subr.bf16.mxu0 %v1097_v12  ;;  %v1112_v27 = vld [vmem:[%s1480_s1 + $0xb0] sm:$0xff]   ;;  %v1116_v33 = vld [vmem:[%s1480_s1 + $0xb8] sm:$0xff]   ;;  %483 = vmatprep.mubr.bf16.mxu0 %v42_v32  ;;  %v1118_v39 = vld [vmem:[%s1480_s1 + $0x100] sm:$0xff]  }
   0xd   :  { %984 = vmatpush3.bf16.msra.mxu1 %v1096_v11  ;;  %v37_v37 = vld [vmem:[%s1479_s0 + $0x18] sm:$0xff]  ;;  %v36_v40 = vld [vmem:[%s1479_s0 + $0x10] sm:$0xff]  ;;  %v1119_v42 = vld [vmem:[%s1480_s1 + $0x148] sm:$0xff]  }
   0xe   :  { %985 = vmatprep.subr.bf16.mxu1 %v1099_v14  ;;  %v44_v38 = vpack.c.bf16 %v37_v37, %v37_v37  ;;  %v43_v41 = vpack.c.bf16 %v36_v40, %v36_v40  ;;  %v1120_v43 = vld [vmem:[%s1480_s1 + $0x108] sm:$0xff]   ;;  %v1121_v45 = vld [vmem:[%s1480_s1 + $0x150] sm:$0xff]   ;;  %v1123_v47 = vld [vmem:[%s1480_s1 + $0x158] sm:$0xff]  }
   0xf   :  { %964 = vmatpush3.bf16.msra.mxu0 %v1098_v13  ;;  %v1122_v46 = vld [vmem:[%s1480_s1 + $0x110] sm:$0xff]   ;;  %v1124_v48 = vld [vmem:[%s1480_s1 + $0x118] sm:$0xff]   ;;  %v1125_v49 = vld [vmem:[%s1480_s1 + $0x160] sm:$0xff]  }
  0x10   :  { %965 = vmatprep.subr.bf16.mxu0 %v1101_v16  ;;  %523 = vmatprep.mubr.bf16.mxu1 %v44_v38  ;;  %v1126_v50 = vld [vmem:[%s1480_s1 + $0x120] sm:$0xff]   ;;  %v1127_v51 = vld [vmem:[%s1480_s1 + $0x168] sm:$0xff]   ;;  %v1129_v55 = vld [vmem:[%s1480_s1 + $0x170] sm:$0xff]  }
  0x11   :  { %986 = vmatpush3.bf16.msra.mxu1 %v1100_v15  ;;  %v1128_v52 = vld [vmem:[%s1480_s1 + $0x128] sm:$0xff]   ;;  %v1133_v53 = vld [vmem:[%s1480_s1 + $0x180] sm:$0xff]   ;;  %v40_v57 = vld [vmem:[%s1479_s0 + $0x30] sm:$0xff] }
  0x12   :  { %987 = vmatprep.subr.bf16.mxu1 %v1103_v18  ;;  %v39_v54 = vld [vmem:[%s1479_s0 + $0x28] sm:$0xff]  ;;  %v47_v58 = vpack.c.bf16 %v40_v57, %v40_v57  ;;  %v1130_v59 = vld [vmem:[%s1480_s1 + $0x130] sm:$0xff]   ;;  %v1131_v60 = vld [vmem:[%s1480_s1 + $0x178] sm:$0xff]  }
  0x13   :  { %966 = vmatpush3.bf16.msra.mxu0 %v1102_v17  ;;  %v46_v56 = vpack.c.bf16 %v39_v54, %v39_v54 }
  0x14   :  { %967 = vmatprep.subr.bf16.mxu0 %v1105_v20 }
  0x15   :  { %988 = vmatpush3.bf16.msra.mxu1 %v1104_v19 }
  0x16   :  { %989 = vmatprep.subr.bf16.mxu1 %v1107_v22 }
  0x17   :  { %968 = vmatpush3.bf16.msra.mxu0 %v1106_v21 }
  0x18   :  { %969 = vmatprep.subr.bf16.mxu0 %v1109_v24 }
  0x19   :  { %990 = vmatpush3.bf16.msra.mxu1 %v1108_v23 }
  0x1a   :  { %991 = vmatprep.subr.bf16.mxu1 %v1111_v26 }
  0x1b   :  { %970 = vmatpush3.bf16.msra.mxu0 %v1110_v25 }
  0x1c   :  { %971 = vmatprep.subr.bf16.mxu0 %v1113_v28 }
  0x1d   :  { %992 = vmatpush3.bf16.msra.mxu1 %v1112_v27 }
  0x1e   :  { %993 = vmatprep.subr.bf16.mxu1 %v1115_v30 }
  0x1f   :  { %972 = vmatpush3.bf16.msra.mxu0 %v1114_v29 }
  0x20   :  { %1001 = vmatprep.subr.bf16.mxu0 %v1117_v36 }
  0x21   :  { %994 = vmatpush3.bf16.msra.mxu1 %v1116_v33 }
  0x22   :  { %484 = vmatmul.mubr.bf16.vlgmr.msra.gmra.mrb[0].mxu0 %v41_v35  ;;  %1040 = vmatprep.subr.bf16.mxu1 %v1174_v44 }
  0x23   :  { %1002 = vmatpush3.bf16.msra.mxu0 %v1118_v39  ;;  %563 = vmatprep.mubr.bf16.mxu0 %v46_v56 }
  0x24   :  { %524 = vmatmul.mubr.bf16.vlgmr.msra.gmra.mrb[0].mxu1 %v43_v41  ;;  %1003 = vmatprep.subr.bf16.mxu0 %v1119_v42 }
  0x25   :  { %1042 = vmatprep.mubr.msk.bf16.mxu1 %vm1175_vm0, %v1174_v44  ;;  %1041 = vmatpush3.bf16.msra.mxu1 %v1133_v53 }
  0x26   :  { %1046 = vmatprep.subr.bf16.mxu1 %v1174_v44 }
  0x27   :  { %1004 = vmatpush3.bf16.msra.mxu0 %v1120_v43 }
  0x28   :  { %1005 = vmatprep.subr.bf16.mxu0 %v1121_v45 }
  0x2b   :  { %1006 = vmatpush3.bf16.msra.mxu0 %v1122_v46 }
  0x2c   :  { %1007 = vmatprep.subr.bf16.mxu0 %v1123_v47  ;;  %1043 = vmatmul.mubr.msk.bf16.vlgmr.msra.gmra.mrb[4].mxu1 %vm447_vm1, %v47_v58 }
  0x2d   :  { %1054 = vmatprep.mubr.msk.bf16.mxu1 %vm1175_vm0, %v1174_v44 }
  0x2f   :  { %1008 = vmatpush3.bf16.msra.mxu0 %v1124_v48 }
  0x30   :  { %1009 = vmatprep.subr.bf16.mxu0 %v1125_v49 }
  0x33   :  { %1010 = vmatpush3.bf16.msra.mxu0 %v1126_v50 }
  0x34   :  { %1011 = vmatprep.subr.bf16.mxu0 %v1127_v51 }
  0x37   :  { %1012 = vmatpush3.bf16.msra.mxu0 %v1128_v52 }
  0x38   :  { %1013 = vmatprep.subr.bf16.mxu0 %v1129_v55 }
  0x39   :  { %14 = vsyncpa [#allocation3], 0  ;;  %v1132_v61 = vld [vmem:[%s1480_s1 + $0x138] sm:$0xff]   ;;  %v38_v62 = vld [vmem:[%s1479_s0 + $0x20] sm:$0xff]  ;;  %vm652_vm2 = vcmask 523264  }
  0x3a   :  { %v45_v63 = vpack.c.bf16 %v38_v62, %v38_v62  ;;  %v1134_v0 = vld [vmem:[%s1482_s3] sm:$0xff]   ;;  %v1135_v1 = vld [vmem:[%s1482_s3 + $0x8] sm:$0xff]   ;;  %v1136_v2 = vld [vmem:[%s1482_s3 + $0x10] sm:$0xff]  }
  0x3b   :  { %1014 = vmatpush3.bf16.msra.mxu0 %v1130_v59  ;;  %1047 = vmatpush3.bf16.msra.mxu1 %v1134_v0  ;;  %v1137_v3 = vld [vmem:[%s1482_s3 + $0x18] sm:$0xff]   ;;  %v888_v5 = vld [vmem:[%s1481_s2] ss:$0 sm:$0xff]  ;;  %v1139_v31 = vld [vmem:[%s1484_s5 + $0x8] sm:$0xff]  }
  0x3c   :  { %1015 = vmatprep.subr.bf16.mxu0 %v1131_v60  ;;  %1048 = vmatprep.subr.bf16.mxu1 %v1174_v44  ;;  %v1138_v29 = vld [vmem:[%s1484_s5] sm:$0xff]   ;;  %v1140_v32 = vld [vmem:[%s1484_s5 + $0x10] sm:$0xff]   ;;  %v1141_v33 = vld [vmem:[%s1484_s5 + $0x18] sm:$0xff]  }
  0x3d   :  { %v1142_v34 = vld [vmem:[%s1486_s7] sm:$0xff]   ;;  %v1143_v35 = vld [vmem:[%s1486_s7 + $0x8] sm:$0xff]   ;;  %v1144_v45 = vld [vmem:[%s1486_s7 + $0x10] sm:$0xff]  }
  0x3e   :  { %v939_v36 = vld [vmem:[%s1483_s4] ss:$0 sm:$0xff]  ;;  %v1145_v46 = vld [vmem:[%s1486_s7 + $0x18] sm:$0xff]  }
  0x3f   :  { %1016 = vmatpush3.bf16.msra.mxu0 %v1132_v61  ;;  %1049 = vmatpush3.bf16.msra.mxu1 %v1135_v1  ;;  %v945_v47 = vld [vmem:[%s1485_s6] ss:$0 sm:$0xff]  ;;  %s1176_s6 = smov [#allocation2]  }
  0x40   :  { %1070 = vmatprep.subr.bf16.mxu0 %v1174_v44  ;;  %1050 = vmatprep.subr.bf16.mxu1 %v1174_v44  ;;  %s880_s7 = sshll.u32 %s1176_s6, 4  ;;  %s881_s7 = int_to_ptr.vmem [resolvable:$true] %s880_s7 }
  0x41   :  { %p1155_p1 = scmp.lt.s32.totalorder %s881_s7, %s881_s7 }
  0x42   :  { %564 = vmatmul.mubr.bf16.vlgmr.msra.gmra.mrb[4].mxu0 %v45_v63 }
  0x43   :  { %1078 = vmatprep.mubr.msk.bf16.mxu0 %vm1175_vm0, %v1174_v44  ;;  %1051 = vmatpush3.bf16.msra.mxu1 %v1136_v2 }
  0x44   :  { %1052 = vmatprep.subr.bf16.mxu1 %v1174_v44  ;;  %1071 = vmatpush3.bf16.msra.mxu0 %v1142_v34 }
  0x45   :  { %1072 = vmatprep.subr.bf16.mxu0 %v1174_v44 }
  0x47   :  { %1053 = vmatpush3.bf16.msra.mxu1 %v1137_v3 }
  0x48   :  { %1058 = vmatprep.subr.bf16.mxu1 %v1174_v44  ;;  %1073 = vmatpush3.bf16.msra.mxu0 %v1143_v35 }
  0x49   :  { %1074 = vmatprep.subr.bf16.mxu0 %v1174_v44 }
  0x4c   :  { %1075 = vmatpush3.bf16.msra.mxu0 %v1144_v45 }
  0x4d   :  { %1076 = vmatprep.subr.bf16.mxu0 %v1174_v44 }
  0x50   :  { %1077 = vmatpush3.bf16.msra.mxu0 %v1145_v46 }
  0xf5   :  { %v973_v4 = vpop.f32.mrb[0].mxu0 }
  0xf6   :  { %v974_v6 = vpop.f32.mrb[1].mxu0 }
  0xf7   :  { %v975_v7 = vadd.f32 %v974_v6, %v973_v4  ;;  %v976_v8 = vpop.f32.mrb[2].mxu0  ;;  %v995_v9 = vpop.f32.mrb[0].mxu1 }
  0xf8   :  { %v977_v10 = vpop.f32.mrb[3].mxu0  ;;  %v996_v12 = vpop.f32.mrb[1].mxu1 }
  0xf9   :  { %v486_v11 = vadd.f32 %v975_v7, %v888_v5  ;;  %v997_v13 = vadd.f32 %v996_v12, %v995_v9  ;;  %v998_v14 = vpop.f32.mrb[2].mxu1 }
  0xfa   :  { %v999_v15 = vpop.f32.mrb[3].mxu1 }
  0xfb   :  { %v526_v16 = vadd.f32 %v997_v13, %v486_v11 }
  0xff   :  { %v605_v17 = vpop.f32.mrb[4].mxu1 }
 0x100   :  { %v1044_v18 = vpop.f32.mrb[5].mxu1 }
 0x101   :  { %v608_v19 = vpop.f32.mrb[6].mxu1 }
 0x102   :  { %v1045_v20 = vpop.f32.mrb[7].mxu1 }
 0x115   :  { %v1017_v21 = vpop.f32.mrb[4].mxu0 }
 0x116   :  { %v1018_v22 = vpop.f32.mrb[5].mxu0 }
 0x117   :  { %v1019_v23 = vadd.f32 %v1018_v22, %v1017_v21  ;;  %v1020_v24 = vpop.f32.mrb[6].mxu0 }
 0x118   :  { %v1021_v25 = vpop.f32.mrb[7].mxu0 }
 0x119   :  { %v566_v26 = vadd.f32 %v1019_v23, %v526_v16 }
 0x11b   :  { %v606_v27 = vadd.f32 %v605_v17, %v566_v26 }
 0x11d   :  { %v611_v28 = vmax.f32 %v606_v27, 0.0 }
 0x11f   :  { %v612_v30 = vpack.c.bf16 %v611_v28, %v611_v28 }
 0x121   :  { %1055 = vmatmul.mubr.msk.bf16.vlgmr.msra.gmra.mrb[8].mxu1 %vm652_vm2, %v612_v30 }
 0x122   :  { %1059 = vmatpush3.bf16.msra.mxu1 %v1138_v29  ;;  %1066 = vmatprep.mubr.msk.bf16.mxu1 %vm1175_vm0, %v1174_v44 }
 0x123   :  { %1060 = vmatprep.subr.bf16.mxu1 %v1174_v44 }
 0x126   :  { %1061 = vmatpush3.bf16.msra.mxu1 %v1139_v31 }
 0x127   :  { %1062 = vmatprep.subr.bf16.mxu1 %v1174_v44 }
 0x12a   :  { %1063 = vmatpush3.bf16.msra.mxu1 %v1140_v32 }
 0x12b   :  { %1064 = vmatprep.subr.bf16.mxu1 %v1174_v44  ;;  %v951_v44 = vld [vmem:[%s1487_s8] ss:$0 sm:$0xff]  ;;  %s1150_s8 = scalar_lea.vmem %s881_s7, 128 }
 0x12c   :  { %p1151_p0 = scmp.ne.s32.totalorder %s881_s7, %s1150_s8  ;;  %p1156_p2 = scmp.lt.s32.totalorder %s1150_s8, %s1150_s8 }
 0x12e   :  { %1065 = vmatpush3.bf16.msra.mxu1 %v1141_v33  ;;  %p1157_p3 = por %p1156_p2, %p1155_p1 }
 0x130   :  { %p1158_p4 = pnand %p1157_p3, %p1151_p0 }
 0x1f4   :  { %v690_v37 = vpop.f32.mrb[8].mxu1 }
 0x1f5   :  { %v691_v38 = vadd.f32 %v939_v36, %v690_v37  ;;  %v1056_v39 = vpop.f32.mrb[9].mxu1 }
 0x1f6   :  { %v693_v40 = vpop.f32.mrb[10].mxu1 }
 0x1f7   :  { %v696_v41 = vmax.f32 %v691_v38, 0.0  ;;  %v1057_v42 = vpop.f32.mrb[11].mxu1 }
 0x1f9   :  { %v697_v43 = vpack.c.bf16 %v696_v41, %v696_v41 }
 0x1fb   :  { %1067 = vmatmul.mubr.msk.bf16.vlgmr.msra.gmra.mrb[12].mxu1 %vm652_vm2, %v697_v43 }
 0x2ce   :  { %v774_v48 = vpop.f32.mrb[12].mxu1 }
 0x2cf   :  { %v775_v49 = vadd.f32 %v945_v47, %v774_v48  ;;  %v1068_v50 = vpop.f32.mrb[13].mxu1 }
 0x2d0   :  { %v777_v51 = vpop.f32.mrb[14].mxu1 }
 0x2d1   :  { %v780_v52 = vmax.f32 %v775_v49, 0.0  ;;  %v1069_v53 = vpop.f32.mrb[15].mxu1 }
 0x2d3   :  { %v781_v54 = vpack.c.bf16 %v780_v52, %v780_v52 }
 0x2d5   :  { %1079 = vmatmul.mubr.msk.bf16.vlgmr.msra.gmra.mrb[8].mxu0 %vm652_vm2, %v781_v54 }
 0x3a8   :  { %v858_v55 = vpop.f32.mrb[8].mxu0 }
 0x3a9   :  { %v859_v56 = vadd.f32 %v951_v44, %v858_v55  ;;  %v1080_v57 = vpop.f32.mrb[9].mxu0 }
 0x3aa   :  { %v861_v58 = vpop.f32.mrb[10].mxu0 }
 0x3ab   :  { %864 = vmax.xlane.f32.xlu0 %v859_v56  ;;  %v1081_v59 = vpop.f32.mrb[11].mxu0 }
 0x438   :  { %v865_v60 = vpop.xlane.xlu0 %864 }
 0x439   :  { %v866_v61 = vsub.f32 %v859_v56, %v865_v60 }
 0x43b   :  { %v867_v62 = vmul.f32 1.442695, %v866_v61 }
 0x43d   :  { %1146 = vpow2.f32 %v867_v62 }
 0x447   :  { %v1147_v63 = vpop.eup %1146 }
 0x448   :  { %869 = vadd.xlane.f32.xlu0 %v1147_v63 }
 0x4d5   :  { %v870_v0 = vpop.xlane.xlu0 %869 }
 0x4d6   :  { %1148 = vrcp.f32 %v870_v0 }
 0x4e0   :  { %v1149_v1 = vpop.eup %1148 }
 0x4e1   :  { %v872_v2 = vmul.f32 %v1149_v1, %v1147_v63 }
 0x4e3   :  { %873 = vst [vmem:[#allocation2] sm:$0xff] %v872_v2 }
 0x4e4   :  { %1161 = shalt.err (!%p1158_p4)
}
 0x4e5   :  { %s1162_s21 = scalar_lea.hbm %s1488_s9, 128 }
 0x4e6   :  { %p1163_p5 = scmp.ne.s32.totalorder %s1488_s9, %s1162_s21  ;;  %p1166_p6 = scmp.lt.u32.totalorder %s1162_s21, %s1488_s9 }
 0x4e8   :  { %p1168_p7 = pnand %p1166_p6, %p1163_p5 }
 0x4ea   :  { %1171 = shalt.err (!%p1168_p7)
}
 0x4eb   :  { %883 = dma.vmem_to_hbm [thread:$0]  %s881_s7, 128, %s1488_s9, [#allocation3]  }
 0x4ec   :  { %1172 = dma.done.wait [#allocation3], 128  }
 0x4ed   :  { %1173 = vsyncadd [#allocation3], 4294967168 }
 0x4ee   :  { %887 = vsyncpa [#allocation3], 1 }

</bundles_post_ra>
